<compile_context>
chip_gen: v7x
topology: tpu7x:2x2x1
jax: 0.10.0
libtpu: 0.0.40
codegen_flags: <defaults>
</compile_context>

<pallas_src>
import jax
import jax.numpy as jnp
from jax.experimental import pallas as pl
from jax.experimental.pallas import tpu as pltpu

_LANES = 128
_SUBLANES = 8
# ~2 MiB per input block; x2 inputs x2 pipeline buffers = ~8 MiB in flight.
# TODO(synk): on v6e (128 MiB VMEM) this could be raised to 4-8 MiB per block
# for a few-percent win; keep <= ~2 MiB if also targeting v5e/v7x.
_TARGET_BLOCK_BYTES = 2 * 1024 * 1024
_VMEM_LIMIT_BYTES = 32 * 1024 * 1024


def _round_up(x, m):
    return (x + m - 1) // m * m


def _cdiv(a, b):
    return -(-a // b)


def _afm_sum_kernel(real_ref, fake_ref, out_ref, acc_ref):
    """Streaming partial reduction of sum(|sigmoid(real) - sigmoid(fake)|).

    real_ref / fake_ref : (B, 2, block_rows, 128) block (ch 0 = valence, 1 = arousal)
    out_ref             : (1, 2) SMEM block of the (n_groups, 2) output
    acc_ref             : (2, 8, 128) f32 VMEM accumulator (per core)
    """
    step = pl.program_id(1)

    @pl.when(step == 0)
    def _():
        acc_ref[...] = jnp.zeros_like(acc_ref)

    b, c, rb, lanes = real_ref.shape
    r = jax.nn.sigmoid(real_ref[...].astype(jnp.float32))
    f = jax.nn.sigmoid(fake_ref[...].astype(jnp.float32))
    wd = jnp.abs(r - f)  # (B, 2, rb, 128) f32
    # Fold batch and row-groups down to one vreg per channel with pure VPU
    # adds; the expensive cross-lane/sublane reduce happens once at the end.
    acc_ref[...] += wd.reshape(b, c, rb // _SUBLANES, _SUBLANES, lanes).sum(axis=(0, 2))

    @pl.when(step == pl.num_programs(1) - 1)
    def _():
        out_ref[0, 0] = jnp.sum(acc_ref[0])  # valence raw sum
        out_ref[0, 1] = jnp.sum(acc_ref[1])  # arousal raw sum


def _level_channel_sums(real2, fake2):
    """real2 / fake2: (B, 2, H*W). Returns (2,) f32 raw per-channel sums of
    |sigmoid(real) - sigmoid(fake)| over all B*H*W elements."""
    B, C, n = real2.shape

    # Pad the flat axis to a multiple of 8*128 so rows is a multiple of 8.
    # Both inputs are zero-padded identically -> |sigmoid(0)-sigmoid(0)| = 0,
    # so padding contributes nothing to the sums.
    n_pad = _round_up(n, _SUBLANES * _LANES)
    if n_pad != n:
        real2 = jnp.pad(real2, ((0, 0), (0, 0), (0, n_pad - n)))
        fake2 = jnp.pad(fake2, ((0, 0), (0, 0), (0, n_pad - n)))
    rows = n_pad // _LANES  # multiple of 8
    real = real2.reshape(B, C, rows, _LANES)
    fake = fake2.reshape(B, C, rows, _LANES)

    # Balanced block_rows selection: never a near-empty padded tail block.
    bytes_per_row = B * C * _LANES * real.dtype.itemsize
    max_rows = max(_SUBLANES,
                   (_TARGET_BLOCK_BYTES // bytes_per_row) // _SUBLANES * _SUBLANES)
    n_blocks = max(1, _cdiv(rows, max_rows))
    n_groups = 2 if n_blocks >= 2 else 1        # v7x: 2 TC-parallel groups
    if n_groups == 2 and n_blocks % 2:
        n_blocks += 1
    block_rows = _round_up(_cdiv(rows, n_blocks), _SUBLANES)
    rows_pad = n_blocks * block_rows
    if rows_pad != rows:
        real = jnp.pad(real, ((0, 0), (0, 0), (0, rows_pad - rows), (0, 0)))
        fake = jnp.pad(fake, ((0, 0), (0, 0), (0, rows_pad - rows), (0, 0)))
    steps = n_blocks // n_groups

    out = pl.pallas_call(
        _afm_sum_kernel,
        out_shape=jax.ShapeDtypeStruct((n_groups, 2), jnp.float32),
        grid=(n_groups, steps),
        in_specs=[
            pl.BlockSpec((B, C, block_rows, _LANES),
                         lambda g, i: (0, 0, g * steps + i, 0)),
            pl.BlockSpec((B, C, block_rows, _LANES),
                         lambda g, i: (0, 0, g * steps + i, 0)),
        ],
        out_specs=pl.BlockSpec((1, 2), lambda g, i: (g, 0),
                               memory_space=pltpu.MemorySpace.SMEM),
        scratch_shapes=[pltpu.VMEM((2, _SUBLANES, _LANES), jnp.float32)],
        compiler_params=pltpu.CompilerParams(
            dimension_semantics=("parallel", "arbitrary"),
            vmem_limit_bytes=_VMEM_LIMIT_BYTES),
    )(real, fake)

    return jnp.sum(out, axis=0)  # combine per-core-group partials -> (2,)


def afm_loss(real_features, fake_features):
    """
    real_features / fake_features: list of (feature_map, v, a) tuples.
      feature_map: (B, C, H, W) with C >= 2; v, a: (B,) (unused, as in PyTorch).
    Returns (loss_v, loss_a) float32 scalars.
    """
    n_levels = len(real_features)
    assert n_levels > 0 and n_levels == len(fake_features)

    loss_v = jnp.float32(0.0)
    loss_a = jnp.float32(0.0)
    for (rf, _rv, _ra), (ff, _fv, _fa) in zip(real_features, fake_features):
        B, C, H, W = rf.shape
        assert C >= 2, "AFMLoss requires at least 2 channels (valence, arousal)"
        assert ff.shape == rf.shape
        sums = _level_channel_sums(rf[:, :2].reshape(B, 2, H * W),
                                   ff[:, :2].reshape(B, 2, H * W))
        scale = 1.0 / (B * H * W)
        loss_v = loss_v + sums[0] * scale
        loss_a = loss_a + sums[1] * scale
    return loss_v / n_levels, loss_a / n_levels


def _reference(real_features, fake_features):
    n = len(real_features)
    lv, la = 0.0, 0.0
    for (rf, _, _), (ff, _, _) in zip(real_features, fake_features):
        lv += jnp.mean(jnp.abs(jax.nn.sigmoid(rf[:, 0:1]) - jax.nn.sigmoid(ff[:, 0:1])))
        la += jnp.mean(jnp.abs(jax.nn.sigmoid(rf[:, 1:2]) - jax.nn.sigmoid(ff[:, 1:2])))
    return lv / n, la / n


if __name__ == "__main__":
    key = jax.random.PRNGKey(0)
    B = 2
    # Three discriminator ERU levels (one with an unaligned spatial size to
    # exercise the zero-padding path).
    level_shapes = [(B, 4, 16, 16), (B, 4, 8, 8), (B, 4, 12, 12)]

    real_features, fake_features = [], []
    for shp in level_shapes:
        key, k1, k2, k3, k4, k5, k6 = jax.random.split(key, 7)
        real_f = jax.random.normal(k1, shp, dtype=jnp.float32)
        fake_f = jax.random.normal(k2, shp, dtype=jnp.float32)
        real_v = jax.random.normal(k3, (B,), dtype=jnp.float32)
        real_a = jax.random.normal(k4, (B,), dtype=jnp.float32)
        fake_v = jax.random.normal(k5, (B,), dtype=jnp.float32)
        fake_a = jax.random.normal(k6, (B,), dtype=jnp.float32)
        real_features.append((real_f, real_v, real_a))
        fake_features.append((fake_f, fake_v, fake_a))

    loss_v, loss_a = afm_loss(real_features, fake_features)
    loss_v = jax.block_until_ready(loss_v)
    loss_a = jax.block_until_ready(loss_a)

    ref_v, ref_a = _reference(real_features, fake_features)
    assert jnp.allclose(loss_v, ref_v, atol=1e-5), (loss_v, ref_v)
    assert jnp.allclose(loss_a, ref_a, atol=1e-5), (loss_a, ref_a)

    print("KERNEL_OK")
</pallas_src>

<mosaic_0001>
module attributes {stable_mosaic.version = 11 : i64} {
  func.func @_afm_sum_kernel(%arg0: i32, %arg1: i32, %arg2: memref<2x2x8x128xf32, #tpu.memory_space<vmem>>, %arg3: memref<2x2x8x128xf32, #tpu.memory_space<vmem>>, %arg4: memref<1x2xf32, #tpu.memory_space<smem>>, %arg5: memref<2x8x128xf32, #tpu.memory_space<vmem>>) attributes {dimension_semantics = [#tpu.dimension_semantics<parallel>, #tpu.dimension_semantics<arbitrary>], iteration_bounds = array<i64: 1, 1>, scalar_prefetch = 0 : i64, scratch_operands = 1 : i64, tpu.core_type = #tpu.core_type<tc>, window_params = [{transform_indices = @transform_0, window_bounds = array<i64: 2, 2, 8, 128>}, {transform_indices = @transform_1, window_bounds = array<i64: 2, 2, 8, 128>}, {transform_indices = @transform_2, window_bounds = array<i64: 1, 2>}]} {
    %c0_i32 = arith.constant 0 : i32
    %0 = arith.cmpi eq, %arg1, %c0_i32 : i32
    %1 = arith.extui %0 : i1 to i32
    %c0_i32_0 = arith.constant 0 : i32
    %2 = arith.cmpi ne, %1, %c0_i32_0 : i32
    scf.if %2 {
      %cst_18 = arith.constant 0.000000e+00 : f32
      %25 = vector.broadcast %cst_18 : f32 to vector<2x8x128xf32>
      %c0_19 = arith.constant 0 : index
      %c0_20 = arith.constant 0 : index
      %c0_21 = arith.constant 0 : index
      %26 = vector.load %arg5[%c0_19, %c0_20, %c0_21] : memref<2x8x128xf32, #tpu.memory_space<vmem>>, vector<2x8x128xf32>
      tpu.vector_store %arg5[%c0_19, %c0_20, %c0_21], %25 {strides = array<i32>} : memref<2x8x128xf32, #tpu.memory_space<vmem>>, vector<2x8x128xf32>,
    } else {
    }
    %c0 = arith.constant 0 : index
    %c0_1 = arith.constant 0 : index
    %c0_2 = arith.constant 0 : index
    %c0_3 = arith.constant 0 : index
    %3 = vector.load %arg2[%c0, %c0_1, %c0_2, %c0_3] : memref<2x2x8x128xf32, #tpu.memory_space<vmem>>, vector<2x2x8x128xf32>
    %4 = arith.negf %3 : vector<2x2x8x128xf32>
    %5 = math.exp %4 : vector<2x2x8x128xf32>
    %cst = arith.constant 1.000000e+00 : f32
    %6 = vector.broadcast %cst : f32 to vector<2x2x8x128xf32>
    %7 = arith.addf %6, %5 : vector<2x2x8x128xf32>
    %8 = arith.divf %6, %7 : vector<2x2x8x128xf32>
    %c0_4 = arith.constant 0 : index
    %c0_5 = arith.constant 0 : index
    %c0_6 = arith.constant 0 : index
    %c0_7 = arith.constant 0 : index
    %9 = vector.load %arg3[%c0_4, %c0_5, %c0_6, %c0_7] : memref<2x2x8x128xf32, #tpu.memory_space<vmem>>, vector<2x2x8x128xf32>
    %10 = arith.negf %9 : vector<2x2x8x128xf32>
    %11 = math.exp %10 : vector<2x2x8x128xf32>
    %cst_8 = arith.constant 1.000000e+00 : f32
    %12 = vector.broadcast %cst_8 : f32 to vector<2x2x8x128xf32>
    %13 = arith.addf %12, %11 : vector<2x2x8x128xf32>
    %14 = arith.divf %12, %13 : vector<2x2x8x128xf32>
    %15 = arith.subf %8, %14 : vector<2x2x8x128xf32>
    %16 = math.absf %15 : vector<2x2x8x128xf32>
    %c0_9 = arith.constant 0 : index
    %c0_10 = arith.constant 0 : index
    %c0_11 = arith.constant 0 : index
    %17 = vector.load %arg5[%c0_9, %c0_10, %c0_11] : memref<2x8x128xf32, #tpu.memory_space<vmem>>, vector<2x8x128xf32>
    %18 = vector.shape_cast %16 : vector<2x2x8x128xf32> to vector<2x2x1x8x128xf32>
    %cst_12 = arith.constant dense<0.000000e+00> : vector<2x8x128xf32>
    %19 = vector.multi_reduction <add>, %18, %cst_12 [0, 2] : vector<2x2x1x8x128xf32> to vector<2x8x128xf32>
    %20 = arith.addf %17, %19 : vector<2x8x128xf32>
    %c0_13 = arith.constant 0 : index
    %c0_14 = arith.constant 0 : index
    %c0_15 = arith.constant 0 : index
    %21 = vector.load %arg5[%c0_13, %c0_14, %c0_15] : memref<2x8x128xf32, #tpu.memory_space<vmem>>, vector<2x8x128xf32>
    tpu.vector_store %arg5[%c0_13, %c0_14, %c0_15], %20 {strides = array<i32>} : memref<2x8x128xf32, #tpu.memory_space<vmem>>, vector<2x8x128xf32>,
    %c0_i32_16 = arith.constant 0 : i32
    %22 = arith.cmpi eq, %arg1, %c0_i32_16 : i32
    %23 = arith.extui %22 : i1 to i32
    %c0_i32_17 = arith.constant 0 : i32
    %24 = arith.cmpi ne, %23, %c0_i32_17 : i32
    scf.if %24 {
      %c0_18 = arith.constant 0 : index
      %c0_19 = arith.constant 0 : index
      %c0_20 = arith.constant 0 : index
      %25 = vector.load %arg5[%c0_18, %c0_19, %c0_20] : memref<2x8x128xf32, #tpu.memory_space<vmem>>, vector<1x8x128xf32>
      %26 = vector.shape_cast %25 : vector<1x8x128xf32> to vector<8x128xf32>
      %27 = vector.shape_cast %26 : vector<8x128xf32> to vector<1x8x128xf32>
      %cst_21 = arith.constant dense<0.000000e+00> : vector<1xf32>
      %28 = vector.multi_reduction <add>, %27, %cst_21 [1, 2] : vector<1x8x128xf32> to vector<1xf32>
      %29 = vector.shape_cast %28 : vector<1xf32> to vector<1x1x1xf32>
      %30 = vector.extract %29[0, 0, 0] : f32 from vector<1x1x1xf32>
      %c0_22 = arith.constant 0 : index
      %c0_23 = arith.constant 0 : index
      %31 = memref.load %arg4[%c0_22, %c0_23] : memref<1x2xf32, #tpu.memory_space<smem>>
      memref.store %30, %arg4[%c0_22, %c0_23] : memref<1x2xf32, #tpu.memory_space<smem>>
      %c1 = arith.constant 1 : index
      %c0_24 = arith.constant 0 : index
      %c0_25 = arith.constant 0 : index
      %32 = vector.load %arg5[%c1, %c0_24, %c0_25] : memref<2x8x128xf32, #tpu.memory_space<vmem>>, vector<1x8x128xf32>
      %33 = vector.shape_cast %32 : vector<1x8x128xf32> to vector<8x128xf32>
      %34 = vector.shape_cast %33 : vector<8x128xf32> to vector<1x8x128xf32>
      %cst_26 = arith.constant dense<0.000000e+00> : vector<1xf32>
      %35 = vector.multi_reduction <add>, %34, %cst_26 [1, 2] : vector<1x8x128xf32> to vector<1xf32>
      %36 = vector.shape_cast %35 : vector<1xf32> to vector<1x1x1xf32>
      %37 = vector.extract %36[0, 0, 0] : f32 from vector<1x1x1xf32>
      %c0_27 = arith.constant 0 : index
      %c1_28 = arith.constant 1 : index
      %38 = memref.load %arg4[%c0_27, %c1_28] : memref<1x2xf32, #tpu.memory_space<smem>>
      memref.store %37, %arg4[%c0_27, %c1_28] : memref<1x2xf32, #tpu.memory_space<smem>>
    } else {
    }
    return
  }
  func.func @transform_0(%arg0: i32, %arg1: i32) -> (i32, i32, i32, i32) {
    %c1_i32 = arith.constant 1 : i32
    %0 = arith.muli %arg0, %c1_i32 : i32
    %1 = arith.addi %0, %arg1 : i32
    %c0_i32 = arith.constant 0 : i32
    %c0_i32_0 = arith.constant 0 : i32
    %c0_i32_1 = arith.constant 0 : i32
    %c0_i32_2 = arith.constant 0 : i32
    return %c0_i32, %c0_i32_0, %1, %c0_i32_1 : i32, i32, i32, i32
  }
  func.func @transform_1(%arg0: i32, %arg1: i32) -> (i32, i32, i32, i32) {
    %c1_i32 = arith.constant 1 : i32
    %0 = arith.muli %arg0, %c1_i32 : i32
    %1 = arith.addi %0, %arg1 : i32
    %c0_i32 = arith.constant 0 : i32
    %c0_i32_0 = arith.constant 0 : i32
    %c0_i32_1 = arith.constant 0 : i32
    %c0_i32_2 = arith.constant 0 : i32
    return %c0_i32, %c0_i32_0, %1, %c0_i32_1 : i32, i32, i32, i32
  }
  func.func @transform_2(%arg0: i32, %arg1: i32) -> (i32, i32) {
    %c0_i32 = arith.constant 0 : i32
    %c0_i32_0 = arith.constant 0 : i32
    return %arg0, %c0_i32 : i32, i32
  }
}

</mosaic_0001>

<bundles_post_ra>
// kernel: tpu_custom_call.1
= control target key start
LH: loop header
LB: loop body
LE: loop exit
PB: predicated region body
PF: predicated region fallthrough
CT: control target
= control target key end

     0   :  { %7 = vsyncpa [#allocation4], 0  ;;  %s334_s0 = inlined_call_operand.hbm [shape: f32[2,2,8,128], index: 0, kind: input, shape index: {}]   ;;  %s335_s1 = inlined_call_operand.hbm [shape: f32[2,2,8,128], index: 1, kind: input, shape index: {}]   ;;  %s336_s2 = inlined_call_operand.hbm [shape: f32[1,2], index: 2, kind: output, shape index: {}]  }
   0x1   :  { %8 = vsyncpa [#allocation7], 0 }
   0x2   :  { %9 = vsyncpa [#allocation5], 0  ;;  %s278_s9 = smov [#allocation3]   ;;  %s218_s13 = scalar_lea.hbm %s334_s0, 512 }
   0x3   :  { %s18_s10 = sshll.u32 %s278_s9, 4  ;;  %p219_p0 = scmp.ne.s32.totalorder %s334_s0, %s218_s13  ;;  %s19_s10 = int_to_ptr.vmem [resolvable:$true] %s18_s10 }
   0x4   :  { %p222_p1 = scmp.lt.u32.totalorder %s218_s13, %s334_s0 }
   0x6   :  { %p224_p2 = pnand %p222_p1, %p219_p0 }
   0x8   :  { %227 = shalt.err (!%p224_p2)
}
   0x9   :  { %s228_s18 = scalar_lea.vmem %s19_s10, 512  ;;  %p233_p4 = scmp.lt.s32.totalorder %s19_s10, %s19_s10 }
   0xa   :  { %p229_p3 = scmp.ne.s32.totalorder %s19_s10, %s228_s18  ;;  %p234_p5 = scmp.lt.s32.totalorder %s228_s18, %s228_s18 }
   0xc   :  { %p235_p6 = por %p234_p5, %p233_p4 }
   0xe   :  { %p236_p7 = pnand %p235_p6, %p229_p3 }
  0x10   :  { %239 = shalt.err (!%p236_p7)
}
  0x11   :  { %s279_s19 = smov 128   ;;  %s280_s20 = smov 8  }
  0x12   :  { %24 = dma.hbm_to_vmem [thread:$0]  %s334_s0, 512, %s19_s10, [#allocation4], %s279_s19, %s279_s19, %s280_s20  }
  0x13   :  { %s281_s23 = smov [#allocation6]   ;;  %s240_s27 = scalar_lea.hbm %s335_s1, 512 }
  0x14   :  { %s33_s24 = sshll.u32 %s281_s23, 4  ;;  %p241_p8 = scmp.ne.s32.totalorder %s335_s1, %s240_s27  ;;  %s34_s24 = int_to_ptr.vmem [resolvable:$true] %s33_s24 }
  0x15   :  { %p244_p9 = scmp.lt.u32.totalorder %s240_s27, %s335_s1 }
  0x17   :  { %p246_p10 = pnand %p244_p9, %p241_p8 }
  0x19   :  { %249 = shalt.err (!%p246_p10)
}
  0x1a   :  { %s250_s4 = scalar_lea.vmem %s34_s24, 512  ;;  %p255_p12 = scmp.lt.s32.totalorder %s34_s24, %s34_s24 }
  0x1b   :  { %p251_p11 = scmp.ne.s32.totalorder %s34_s24, %s250_s4  ;;  %p256_p13 = scmp.lt.s32.totalorder %s250_s4, %s250_s4 }
  0x1d   :  { %p257_p0 = por %p256_p13, %p255_p12 }
  0x1f   :  { %p258_p1 = pnand %p257_p0, %p251_p11 }
  0x21   :  { %261 = shalt.err (!%p258_p1)
}
  0x22   :  { %39 = dma.hbm_to_vmem [thread:$0]  %s335_s1, 512, %s34_s24, [#allocation7], %s279_s19, %s279_s19, %s280_s20  }
  0x23   :  { %272 = dma.done.wait [#allocation4], 512  }
  0x24   :  { %273 = vsyncadd [#allocation4], 4294966784 }
  0x25   :  { %274 = dma.done.wait [#allocation7], 512  }
  0x26   :  { %275 = vsyncadd [#allocation7], 4294966784  ;;  %v54_v0 = vld [vmem:[#allocation3] sm:$0xff]  ;;  %v56_v1 = vld [vmem:[#allocation3 + $0x10] sm:$0xff]  ;;  %s262_s9 = scalar_lea.hbm %s336_s2, 16 }
  0x27   :  { %v82_v2 = vld [vmem:[#allocation6] sm:$0xff]  ;;  %v169_v3 = vmul.f32 -1.442695, %v54_v0  ;;  %v171_v4 = vmul.f32 -1.442695, %v56_v1  ;;  %v84_v5 = vld [vmem:[#allocation6 + $0x10] sm:$0xff]  ;;  %p263_p2 = scmp.ne.s32.totalorder %s336_s2, %s262_s9  ;;  %p266_p3 = scmp.lt.u32.totalorder %s262_s9, %s336_s2 }
  0x28   :  { %v55_v6 = vld [vmem:[#allocation3 + $0x8] sm:$0xff]  ;;  %v173_v7 = vmul.f32 -1.442695, %v82_v2  ;;  %v175_v8 = vmul.f32 -1.442695, %v84_v5  ;;  %v57_v9 = vld [vmem:[#allocation3 + $0x18] sm:$0xff] }
  0x29   :  { %v83_v10 = vld [vmem:[#allocation6 + $0x8] sm:$0xff]  ;;  %186 = vpow2.f32 %v169_v3  ;;  %v170_v11 = vmul.f32 -1.442695, %v55_v6  ;;  %v85_v12 = vld [vmem:[#allocation6 + $0x18] sm:$0xff]  ;;  %v172_v13 = vmul.f32 -1.442695, %v57_v9  ;;  %p268_p4 = pnand %p266_p3, %p263_p2 }
  0x2a   :  { %188 = vpow2.f32 %v171_v4  ;;  %v174_v14 = vmul.f32 -1.442695, %v83_v10  ;;  %v176_v15 = vmul.f32 -1.442695, %v85_v12 }
  0x2b   :  { %190 = vpow2.f32 %v173_v7 }
  0x2c   :  { %192 = vpow2.f32 %v175_v8 }
  0x2d   :  { %194 = vpow2.f32 %v170_v11 }
  0x2e   :  { %196 = vpow2.f32 %v172_v13 }
  0x2f   :  { %198 = vpow2.f32 %v174_v14 }
  0x30   :  { %200 = vpow2.f32 %v176_v15 }
  0x33   :  { %v187_v16 = vpop.eup %186 }
  0x34   :  { %v189_v17 = vpop.eup %188  ;;  %v70_v18 = vadd.f32 1.0, %v187_v16 }
  0x35   :  { %v191_v19 = vpop.eup %190  ;;  %v72_v20 = vadd.f32 1.0, %v189_v17 }
  0x36   :  { %v193_v21 = vpop.eup %192  ;;  %202 = vrcp.f32 %v70_v18  ;;  %v98_v22 = vadd.f32 1.0, %v191_v19 }
  0x37   :  { %v195_v23 = vpop.eup %194  ;;  %204 = vrcp.f32 %v72_v20  ;;  %v100_v24 = vadd.f32 1.0, %v193_v21 }
  0x38   :  { %v197_v25 = vpop.eup %196  ;;  %206 = vrcp.f32 %v98_v22  ;;  %v71_v26 = vadd.f32 1.0, %v195_v23 }
  0x39   :  { %v199_v27 = vpop.eup %198  ;;  %208 = vrcp.f32 %v100_v24  ;;  %v73_v28 = vadd.f32 1.0, %v197_v25 }
  0x3a   :  { %v201_v29 = vpop.eup %200  ;;  %210 = vrcp.f32 %v71_v26  ;;  %v99_v30 = vadd.f32 1.0, %v199_v27 }
  0x3b   :  { %212 = vrcp.f32 %v73_v28  ;;  %v101_v31 = vadd.f32 1.0, %v201_v29 }
  0x3c   :  { %214 = vrcp.f32 %v99_v30 }
  0x3d   :  { %216 = vrcp.f32 %v101_v31 }
  0x40   :  { %v203_v32 = vpop.eup %202 }
  0x41   :  { %v205_v33 = vpop.eup %204 }
  0x42   :  { %v207_v34 = vpop.eup %206 }
  0x43   :  { %v209_v35 = vpop.eup %208  ;;  %v110_v36 = vsub.f32 %v203_v32, %v207_v34 }
  0x44   :  { %v211_v37 = vpop.eup %210  ;;  %v112_v38 = vsub.f32 %v205_v33, %v209_v35 }
  0x45   :  { %v213_v39 = vpop.eup %212  ;;  %v114_v40 = vand.u32 2147483647, %v110_v36 }
  0x46   :  { %v215_v41 = vpop.eup %214  ;;  %v116_v42 = vand.u32 2147483647, %v112_v38 }
  0x47   :  { %v217_v43 = vpop.eup %216  ;;  %v111_v44 = vsub.f32 %v211_v37, %v215_v41 }
  0x48   :  { %v120_v45 = vadd.f32 %v116_v42, %v114_v40  ;;  %v113_v46 = vsub.f32 %v213_v39, %v217_v43 }
  0x49   :  { %v115_v47 = vand.u32 2147483647, %v111_v44 }
  0x4a   :  { %130 = vadd.xlane.f32.xlu0 %v120_v45  ;;  %v117_v48 = vand.u32 2147483647, %v113_v46 }
  0x4c   :  { %v121_v49 = vadd.f32 %v117_v48, %v115_v47 }
  0x4e   :  { %143 = vadd.xlane.f32.xlu0 %v121_v49 }
  0xd7   :  { %v131_v50 = vpop.xlane.xlu0 %130 }
  0xd8   :  { %v132_v51 = vrot.slane %v131_v50, 4 }
  0xda   :  { %v133_v52 = vadd.f32 %v132_v51, %v131_v50 }
  0xdb   :  { %v144_v53 = vpop.xlane.xlu0 %143 }
  0xdc   :  { %v134_v54 = vrot.slane %v133_v52, 2  ;;  %v145_v55 = vrot.slane %v144_v53, 4 }
  0xde   :  { %v146_v56 = vadd.f32 %v145_v55, %v144_v53  ;;  %v135_v57 = vadd.f32 %v134_v54, %v133_v52 }
  0xe0   :  { %v147_v58 = vrot.slane %v146_v56, 2  ;;  %v136_v59 = vrot.slane %v135_v57, 1 }
  0xe2   :  { %v148_v60 = vadd.f32 %v147_v58, %v146_v56  ;;  %v137_v61 = vadd.f32 %v136_v59, %v135_v57 }
  0xe4   :  { %177 = vpush %v137_v61  ;;  %v149_v62 = vrot.slane %v148_v60, 1 }
  0xe6   :  { %v150_v63 = vadd.f32 %v149_v62, %v148_v60 }
  0xe8   :  { %179 = vpush %v150_v63 }
 0x115   :  { %s178_s1 = spop %177 }
 0x116   :  { %140 = sst [smem:[#allocation8]] %s178_s1 }
 0x119   :  { %s180_s6 = spop %179 }
 0x11a   :  { %153 = sst [smem:[#allocation8 + $0x1]] %s180_s6 }
 0x11b   :  { %271 = shalt.err (!%p268_p4)
}
 0x11c   :  { %s282_s14 = smov [#allocation8]  }
 0x11d   :  { %161 = dma.smem_to_hbm %s282_s14, 16, %s336_s2, [#allocation5]  }
 0x11e   :  { %276 = dma.done.wait [#allocation5], 16  }
 0x11f   :  { %277 = vsyncadd [#allocation5], 4294967280 }
 0x120   :  { %165 = sfence }
 0x121   :  { %166 = vsyncpa [#allocation4], 1 }
 0x122   :  { %167 = vsyncpa [#allocation7], 1 }
 0x123   :  { %168 = vsyncpa [#allocation5], 1 }

</bundles_post_ra>
